<compile_context>
chip_gen: v5e
topology: v5e:2x2
jax: 0.10.0
libtpu: 0.0.40
codegen_flags: <defaults>
</compile_context>

<pallas_src>
import jax
import jax.numpy as jnp
from jax.experimental import pallas as pl
from jax.experimental.pallas import tpu as pltpu


# --------------------------------------------------------------------------- #
# helpers
# --------------------------------------------------------------------------- #
def _cdiv(a, b):
    return -(-a // b)


def _round_up(n, m):
    return ((n + m - 1) // m) * m


def _pad2d(a, rows, cols, dtype):
    out = jnp.zeros((rows, cols), dtype)
    return out.at[: a.shape[0], : a.shape[1]].set(a.astype(dtype))


def _spec(shape, index_map, *, buffers=None):
    """BlockSpec with optional buffer-count override (graceful fallback)."""
    if buffers is not None and hasattr(pl, "Buffered"):
        try:
            return pl.BlockSpec(shape, index_map, pipeline_mode=pl.Buffered(buffers))
        except TypeError:
            pass
    return pl.BlockSpec(shape, index_map)


def _vmem_budget():
    """(tile-sizing budget, vmem_limit_bytes to request), generation-aware."""
    try:
        cap = int(pltpu.get_tpu_info().vmem_capacity_bytes)
    except Exception:
        cap = 64 * 1024 * 1024  # conservative (v7x-sized) fallback
    limit = int(cap * 0.85)     # never request all of physical VMEM
    budget = int(cap * 0.72)    # leave room for compiler scratch / regalloc
    return budget, limit


# --------------------------------------------------------------------------- #
# kernel: grid = (batch tiles, K blocks)  ->  ("parallel", "arbitrary")
# --------------------------------------------------------------------------- #
def _rna_encoder_kernel(x_ref, w1_ref, b1_ref, w2_ref, b2_ref, o_ref, h_acc):
    k = pl.program_id(1)

    @pl.when(k == 0)
    def _():
        h_acc[...] = jnp.zeros_like(h_acc)

    # f32 -> bf16 cast on the VMEM tile (no extra HBM round trip for x).
    xb = x_ref[...].astype(w1_ref.dtype)
    h_acc[...] += jnp.dot(xb, w1_ref[...], preferred_element_type=jnp.float32)

    @pl.when(k == pl.num_programs(1) - 1)
    def _():
        h = jnp.maximum(h_acc[...] + b1_ref[...], 0.0)
        # Dropout(0.3): identity in eval mode (see TODO in header).
        h = h.astype(w2_ref.dtype)
        y = jnp.dot(h, w2_ref[...], preferred_element_type=jnp.float32)
        o_ref[...] = jnp.maximum(y + b2_ref[...], 0.0).astype(o_ref.dtype)


# --------------------------------------------------------------------------- #
# parameter preparation (hoisted out of the hot path)
# --------------------------------------------------------------------------- #
def prepare_params(w1, b1, w2, b2, *, compute_dtype=jnp.bfloat16, pad_g_to=1):
    """One-time pad/cast of the weights into kernel layout.

    Hp / Op (lane dims) are padded to multiples of 128; the contraction dim G
    is padded only if pad_g_to > 1 (set pad_g_to=128 when K-blocking is
    expected, e.g. very large G*hidden).
    """
    G, hidden = w1.shape
    out = w2.shape[1]
    Gp = _round_up(G, pad_g_to)
    Hp = _round_up(hidden, 128)
    Op = _round_up(out, 128)
    w1p = _pad2d(w1, Gp, Hp, compute_dtype)
    w2p = _pad2d(w2, Hp, Op, compute_dtype)
    b1p = _pad2d(b1.reshape(1, -1), 1, Hp, jnp.float32)
    b2p = _pad2d(b2.reshape(1, -1), 1, Op, jnp.float32)
    dims = dict(G=G, hidden=hidden, out=out)
    return (w1p, b1p, w2p, b2p), dims


# --------------------------------------------------------------------------- #
# forward (hot path: no per-call weight padding / casting)
# --------------------------------------------------------------------------- #
def rna_encoder_forward(x, prepared, dims, *, batch_tile=512, block_k=None,
                        out_dtype=jnp.float32):
    w1p, b1p, w2p, b2p = prepared
    B, G = x.shape
    assert G == dims["G"], "x feature dim does not match prepared params"
    out = dims["out"]
    G_w, Hp = w1p.shape
    Op = w2p.shape[1]

    w_isz = jnp.dtype(w1p.dtype).itemsize
    x_isz = jnp.dtype(x.dtype).itemsize
    out_isz = jnp.dtype(out_dtype).itemsize

    budget, vmem_cap_limit = _vmem_budget()

    # ---- batch tile: minimize padding waste; >=2 grid steps when the batch is
    #      large enough so both v7x TensorCores get work on the parallel axis.
    Bp8 = _round_up(B, 8)
    n_b = max(_cdiv(Bp8, batch_tile), 1)
    if n_b == 1 and Bp8 >= 256:
        n_b = 2
    tb = _round_up(_cdiv(Bp8, n_b), 8)

    # ---- VMEM residency estimate (includes intermediates + headroom) ----
    def vmem_estimate(tb_, tk_, nk_):
        x_tile = 2 * tb_ * tk_ * x_isz                      # f32 x tile, 2 bufs
        w1_tile = (1 if nk_ == 1 else 2) * tk_ * Hp * w_isz
        w2_tile = Hp * Op * w_isz                           # single-buffered
        biases = (Hp + Op) * 4
        o_tile = 2 * tb_ * Op * out_isz
        h_f32 = tb_ * Hp * 4                                # accumulator scratch
        h_bf16 = tb_ * Hp * w_isz                           # bf16 copy of h
        headroom = 4 * 1024 * 1024                          # Mosaic internal
        return x_tile + w1_tile + w2_tile + biases + o_tile + h_f32 + h_bf16 + headroom

    # ---- contraction (K) blocking instead of shrinking tb toward 8 ----
    if block_k is not None:
        tk = min(_round_up(block_k, 128), _round_up(G_w, 128))
    elif vmem_estimate(tb, G_w, 1) <= budget:
        tk = G_w
    else:
        tk = _round_up(G_w, 128)
        while tk > 128 and vmem_estimate(tb, tk, 2) > budget:
            tk = max(128, _round_up(tk // 2, 128))

    if tk >= G_w:
        tk, Gp, n_k = G_w, G_w, 1
    else:
        n_k = _cdiv(G_w, tk)
        Gp = n_k * tk

    # Last resort: shrink tb (never below 128 rows / the whole batch).
    min_tb = min(128, tb)
    while vmem_estimate(tb, tk, n_k) > budget and tb > min_tb:
        tb = max(min_tb, _round_up(_cdiv(tb, 2), 8))
    Bp = _round_up(Bp8, tb)

    # ---- operand padding (zero pads are mathematically inert) ----
    if w1p.shape[0] != Gp:
        # TODO(synk): for repeated large-G inference call prepare_params(pad_g_to=128)
        #             so this per-call weight pad is hoisted out of the hot path.
        w1p = _pad2d(w1p, Gp, Hp, w1p.dtype)
    if (Bp, Gp) != (B, G):
        xp = jnp.zeros((Bp, Gp), x.dtype).at[:B, :G].set(x)
    else:
        xp = x

    grid = (Bp // tb, n_k)

    in_specs = [
        pl.BlockSpec((tb, tk), lambda i, k: (i, k)),                       # x tile
        _spec((tk, Hp), lambda i, k: (k, 0),
              buffers=1 if n_k == 1 else None),                            # W1
        _spec((1, Hp), lambda i, k: (0, 0), buffers=1),                    # b1
        _spec((Hp, Op), lambda i, k: (0, 0), buffers=1),                   # W2
        _spec((1, Op), lambda i, k: (0, 0), buffers=1),                    # b2
    ]

    flops = 2 * Bp * (Gp * Hp + Hp * Op)
    bytes_accessed = (
        Bp * Gp * x_isz
        + (Gp * Hp + Hp * Op) * w_isz
        + (Hp + Op) * 4
        + Bp * Op * out_isz
    )
    cost = pl.CostEstimate(flops=flops, transcendentals=0,
                           bytes_accessed=bytes_accessed)

    vmem_limit = int(min(vmem_cap_limit,
                         max(vmem_estimate(tb, tk, n_k), 32 * 1024 * 1024)))

    y_padded = pl.pallas_call(
        _rna_encoder_kernel,
        out_shape=jax.ShapeDtypeStruct((Bp, Op), out_dtype),
        grid_spec=pltpu.PrefetchScalarGridSpec(
            num_scalar_prefetch=0,
            grid=grid,
            in_specs=in_specs,
            out_specs=pl.BlockSpec((tb, Op), lambda i, k: (i, 0)),
            scratch_shapes=[pltpu.VMEM((tb, Hp), jnp.float32)],
        ),
        compiler_params=pltpu.CompilerParams(
            dimension_semantics=("parallel", "arbitrary"),
            vmem_limit_bytes=vmem_limit,
        ),
        cost_estimate=cost,
    )(xp, w1p, b1p, w2p, b2p)

    return y_padded[:B, :out]


def rna_encoder(x, w1, b1, w2, b2, **kwargs):
    """Convenience one-shot wrapper (pads weights on every call — prefer
    prepare_params + rna_encoder_forward for repeated inference)."""
    prepared, dims = prepare_params(w1, b1, w2, b2)
    return rna_encoder_forward(x, prepared, dims, **kwargs)


# --------------------------------------------------------------------------- #
# test harness
# --------------------------------------------------------------------------- #
def init_params(key, G, hidden, out):
    """Mimics torch.nn.Linear default init: U[-1/sqrt(fan_in), +1/sqrt(fan_in)]."""
    k1, k2, k3, k4 = jax.random.split(key, 4)
    b1_ = 1.0 / jnp.sqrt(G)
    b2_ = 1.0 / jnp.sqrt(hidden)
    w1 = jax.random.uniform(k1, (G, hidden), jnp.float32, -b1_, b1_)
    b1 = jax.random.uniform(k2, (hidden,), jnp.float32, -b1_, b1_)
    w2 = jax.random.uniform(k3, (hidden, out), jnp.float32, -b2_, b2_)
    b2 = jax.random.uniform(k4, (out,), jnp.float32, -b2_, b2_)
    return w1, b1, w2, b2


def _ref_f32(x, w1, b1, w2, b2):
    h = jnp.maximum(x @ w1 + b1, 0.0)
    return jnp.maximum(h @ w2 + b2, 0.0)


def _ref_bf16(x, w1, b1, w2, b2):
    bf = lambda a: a.astype(jnp.bfloat16).astype(jnp.float32)
    h = jnp.maximum(bf(x) @ bf(w1) + b1, 0.0)
    return jnp.maximum(bf(h) @ bf(w2) + b2, 0.0)


def _check_case(B, G, hidden, out, key, *, pad_g_to=1, block_k=None):
    kx, kp = jax.random.split(key)
    x = jax.random.normal(kx, (B, G), jnp.float32)
    w1, b1, w2, b2 = init_params(kp, G, hidden, out)

    prepared, dims = prepare_params(w1, b1, w2, b2, pad_g_to=pad_g_to)
    y = jax.block_until_ready(
        rna_encoder_forward(x, prepared, dims, block_k=block_k))
    assert y.shape == (B, out), f"bad output shape {y.shape}"

    ref_bf = _ref_bf16(x, w1, b1, w2, b2)
    assert jnp.allclose(y, ref_bf, atol=1e-2, rtol=1e-2), \
        "mismatch vs bf16-emulated reference"

    ref32 = _ref_f32(x, w1, b1, w2, b2)
    assert jnp.allclose(y, ref32, atol=1e-1, rtol=1e-1), \
        "mismatch vs f32 reference"


if __name__ == "__main__":
    key = jax.random.PRNGKey(0)
    k1, k2 = jax.random.split(key)

    # Module-default hidden/out with small B/G; exercises batch + lane padding.
    _check_case(B=6, G=40, hidden=256, out=128, key=k1)

    # Forced K-blocking path (contraction split over 2 grid steps + accumulator).
    _check_case(B=16, G=512, hidden=256, out=128, key=k2,
                pad_g_to=128, block_k=256)

    print("KERNEL_OK")
</pallas_src>

<mosaic_0001>
module attributes {stable_mosaic.version = 11 : i64} {
  func.func @_rna_encoder_kernel(%arg0: i32, %arg1: i32, %arg2: memref<8x40xf32, #tpu.memory_space<vmem>>, %arg3: memref<40x256xbf16, #tpu.memory_space<vmem>>, %arg4: memref<1x256xf32, #tpu.memory_space<vmem>>, %arg5: memref<256x128xbf16, #tpu.memory_space<vmem>>, %arg6: memref<1x128xf32, #tpu.memory_space<vmem>>, %arg7: memref<8x128xf32, #tpu.memory_space<vmem>>, %arg8: memref<8x256xf32, #tpu.memory_space<vmem>>) attributes {dimension_semantics = [#tpu.dimension_semantics<parallel>, #tpu.dimension_semantics<arbitrary>], iteration_bounds = array<i64: 1, 1>, scalar_prefetch = 0 : i64, scratch_operands = 1 : i64, tpu.core_type = #tpu.core_type<tc>, window_params = [{transform_indices = @transform_0, window_bounds = array<i64: 8, 40>}, {pipeline_mode = #tpu.pipeline_mode<synchronous>, transform_indices = @transform_1, window_bounds = array<i64: 40, 256>}, {pipeline_mode = #tpu.pipeline_mode<synchronous>, transform_indices = @transform_2, window_bounds = array<i64: 1, 256>}, {pipeline_mode = #tpu.pipeline_mode<synchronous>, transform_indices = @transform_3, window_bounds = array<i64: 256, 128>}, {pipeline_mode = #tpu.pipeline_mode<synchronous>, transform_indices = @transform_4, window_bounds = array<i64: 1, 128>}, {transform_indices = @transform_5, window_bounds = array<i64: 8, 128>}]} {
    %c0_i32 = arith.constant 0 : i32
    %0 = arith.cmpi eq, %arg1, %c0_i32 : i32
    %1 = arith.extui %0 : i1 to i32
    %c0_i32_0 = arith.constant 0 : i32
    %2 = arith.cmpi ne, %1, %c0_i32_0 : i32
    scf.if %2 {
      %cst_10 = arith.constant 0.000000e+00 : f32
      %13 = vector.broadcast %cst_10 : f32 to vector<8x256xf32>
      %c0_11 = arith.constant 0 : index
      %c0_12 = arith.constant 0 : index
      %14 = vector.load %arg8[%c0_11, %c0_12] : memref<8x256xf32, #tpu.memory_space<vmem>>, vector<8x256xf32>
      tpu.vector_store %arg8[%c0_11, %c0_12], %13 {strides = array<i32>} : memref<8x256xf32, #tpu.memory_space<vmem>>, vector<8x256xf32>,
    } else {
    }
    %c0 = arith.constant 0 : index
    %c0_1 = arith.constant 0 : index
    %3 = vector.load %arg2[%c0, %c0_1] : memref<8x40xf32, #tpu.memory_space<vmem>>, vector<8x40xf32>
    %4 = arith.truncf %3 : vector<8x40xf32> to vector<8x40xbf16>
    %c0_2 = arith.constant 0 : index
    %c0_3 = arith.constant 0 : index
    %5 = vector.load %arg8[%c0_2, %c0_3] : memref<8x256xf32, #tpu.memory_space<vmem>>, vector<8x256xf32>
    %c0_4 = arith.constant 0 : index
    %c0_5 = arith.constant 0 : index
    %6 = vector.load %arg3[%c0_4, %c0_5] : memref<40x256xbf16, #tpu.memory_space<vmem>>, vector<40x256xbf16>
    %cst = arith.constant dense<0.000000e+00> : vector<8x256xf32>
    %7 = tpu.matmul %4, %6, %cst {dimension_numbers = #tpu.dot_dimension_numbers<[1], [0], [0], [1], [0, 0, 1, 1], [], []>} : vector<8x40xbf16>, vector<40x256xbf16>, vector<8x256xf32> -> vector<8x256xf32>
    %8 = arith.addf %5, %7 : vector<8x256xf32>
    %c0_6 = arith.constant 0 : index
    %c0_7 = arith.constant 0 : index
    %9 = vector.load %arg8[%c0_6, %c0_7] : memref<8x256xf32, #tpu.memory_space<vmem>>, vector<8x256xf32>
    tpu.vector_store %arg8[%c0_6, %c0_7], %8 {strides = array<i32>} : memref<8x256xf32, #tpu.memory_space<vmem>>, vector<8x256xf32>,
    %c0_i32_8 = arith.constant 0 : i32
    %10 = arith.cmpi eq, %arg1, %c0_i32_8 : i32
    %11 = arith.extui %10 : i1 to i32
    %c0_i32_9 = arith.constant 0 : i32
    %12 = arith.cmpi ne, %11, %c0_i32_9 : i32
    scf.if %12 {
      %c0_10 = arith.constant 0 : index
      %c0_11 = arith.constant 0 : index
      %13 = vector.load %arg8[%c0_10, %c0_11] : memref<8x256xf32, #tpu.memory_space<vmem>>, vector<8x256xf32>
      %c0_12 = arith.constant 0 : index
      %c0_13 = arith.constant 0 : index
      %14 = vector.load %arg4[%c0_12, %c0_13] : memref<1x256xf32, #tpu.memory_space<vmem>>, vector<1x256xf32>
      %15 = vector.broadcast %14 : vector<1x256xf32> to vector<8x256xf32>
      %16 = arith.addf %13, %15 : vector<8x256xf32>
      %cst_14 = arith.constant 0.000000e+00 : f32
      %17 = vector.broadcast %cst_14 : f32 to vector<8x256xf32>
      %18 = arith.maximumf %16, %17 : vector<8x256xf32>
      %19 = arith.truncf %18 : vector<8x256xf32> to vector<8x256xbf16>
      %c0_15 = arith.constant 0 : index
      %c0_16 = arith.constant 0 : index
      %20 = vector.load %arg5[%c0_15, %c0_16] : memref<256x128xbf16, #tpu.memory_space<vmem>>, vector<256x128xbf16>
      %cst_17 = arith.constant dense<0.000000e+00> : vector<8x128xf32>
      %21 = tpu.matmul %19, %20, %cst_17 {dimension_numbers = #tpu.dot_dimension_numbers<[1], [0], [0], [1], [0, 0, 1, 1], [], []>} : vector<8x256xbf16>, vector<256x128xbf16>, vector<8x128xf32> -> vector<8x128xf32>
      %c0_18 = arith.constant 0 : index
      %c0_19 = arith.constant 0 : index
      %22 = vector.load %arg6[%c0_18, %c0_19] : memref<1x128xf32, #tpu.memory_space<vmem>>, vector<1x128xf32>
      %23 = vector.broadcast %22 : vector<1x128xf32> to vector<8x128xf32>
      %24 = arith.addf %21, %23 : vector<8x128xf32>
      %cst_20 = arith.constant 0.000000e+00 : f32
      %25 = vector.broadcast %cst_20 : f32 to vector<8x128xf32>
      %26 = arith.maximumf %24, %25 : vector<8x128xf32>
      %c0_21 = arith.constant 0 : index
      %c0_22 = arith.constant 0 : index
      %27 = vector.load %arg7[%c0_21, %c0_22] : memref<8x128xf32, #tpu.memory_space<vmem>>, vector<8x128xf32>
      tpu.vector_store %arg7[%c0_21, %c0_22], %26 {strides = array<i32>} : memref<8x128xf32, #tpu.memory_space<vmem>>, vector<8x128xf32>,
    } else {
    }
    return
  }
  func.func @transform_0(%arg0: i32, %arg1: i32) -> (i32, i32) {
    %c0_i32 = arith.constant 0 : i32
    return %arg0, %arg1 : i32, i32
  }
  func.func @transform_1(%arg0: i32, %arg1: i32) -> (i32, i32) {
    %c0_i32 = arith.constant 0 : i32
    %c0_i32_0 = arith.constant 0 : i32
    return %arg1, %c0_i32 : i32, i32
  }
  func.func @transform_2(%arg0: i32, %arg1: i32) -> (i32, i32) {
    %c0_i32 = arith.constant 0 : i32
    %c0_i32_0 = arith.constant 0 : i32
    %c0_i32_1 = arith.constant 0 : i32
    return %c0_i32, %c0_i32_0 : i32, i32
  }
  func.func @transform_3(%arg0: i32, %arg1: i32) -> (i32, i32) {
    %c0_i32 = arith.constant 0 : i32
    %c0_i32_0 = arith.constant 0 : i32
    %c0_i32_1 = arith.constant 0 : i32
    return %c0_i32, %c0_i32_0 : i32, i32
  }
  func.func @transform_4(%arg0: i32, %arg1: i32) -> (i32, i32) {
    %c0_i32 = arith.constant 0 : i32
    %c0_i32_0 = arith.constant 0 : i32
    %c0_i32_1 = arith.constant 0 : i32
    return %c0_i32, %c0_i32_0 : i32, i32
  }
  func.func @transform_5(%arg0: i32, %arg1: i32) -> (i32, i32) {
    %c0_i32 = arith.constant 0 : i32
    %c0_i32_0 = arith.constant 0 : i32
    return %arg0, %c0_i32 : i32, i32
  }
}

</mosaic_0001>

<bundles_post_ra>
// kernel: tpu_custom_call.1
= control target key start
LH: loop header
LB: loop body
LE: loop exit
PB: predicated region body
PF: predicated region fallthrough
CT: control target
= control target key end

     0   :  { %10 = vsyncpa [#allocation4], 0  ;;  %s655_s0 = inlined_call_operand.hbm [shape: f32[8,40], index: 0, kind: input, shape index: {}]   ;;  %s656_s1 = inlined_call_operand.hbm [shape: bf16[40,256], index: 1, kind: input, shape index: {}]   ;;  %s657_s2 = inlined_call_operand.hbm [shape: f32[1,256], index: 2, kind: input, shape index: {}]   ;;  %s658_s3 = inlined_call_operand.hbm [shape: bf16[256,128], index: 3, kind: input, shape index: {}]   ;;  %s659_s4 = inlined_call_operand.vmem [shape: f32[1,128], index: 4, kind: input, shape index: {}]   ;;  %s660_s5 = inlined_call_operand.hbm [shape: f32[8,128], index: 5, kind: output, shape index: {}]  }
   0x1   :  { %11 = vsyncpa [#allocation7], 0 }
   0x2   :  { %12 = vsyncpa [#allocation10], 0  ;;  %s29_s20 = sshll.u32 %s656_s1, 4  ;;  %s30_s20 = int_to_ptr.hbm [resolvable:$true] %s29_s20 }
   0x3   :  { %13 = vsyncpa [#allocation5], 0  ;;  %s598_s21 = smov [#allocation6]   ;;  %s19_s25 = sshll.u32 %s655_s0, 4  ;;  %s20_s25 = int_to_ptr.hbm [resolvable:$true] %s19_s25 }
   0x4   :  { %s31_s22 = sshll.u32 %s598_s21, 4  ;;  %s599_s26 = smov 128   ;;  %s32_s22 = int_to_ptr.vmem [resolvable:$true] %s31_s22 }
   0x5   :  { %s600_s27 = smov 8   ;;  %s601_s28 = smov [#allocation3]  }
   0x6   :  { %37 = dma.hbm_to_vmem [thread:$0]  %s30_s20, 640, %s32_s22, [#allocation7], %s599_s26, %s599_s26, %s600_s27  }
   0x7   :  { %s21_s29 = sshll.u32 %s601_s28, 4  ;;  %s43_s7 = sshll.u32 %s657_s2, 4  ;;  %s22_s29 = int_to_ptr.vmem [resolvable:$true] %s21_s29  ;;  %s44_s7 = int_to_ptr.hbm [resolvable:$true] %s43_s7 }
   0x8   :  { %24 = dma.hbm_to_vmem [thread:$0]  %s20_s25, 128, %s22_s29, [#allocation4]  }
   0x9   :  { %s53_s9 = sshll.u32 %s658_s3, 4  ;;  %s602_s10 = smov [#allocation8]   ;;  %s54_s9 = int_to_ptr.hbm [resolvable:$true] %s53_s9 }
   0xa   :  { %s45_s11 = sshll.u32 %s602_s10, 4  ;;  %s603_s0 = smov [#allocation9]   ;;  %s46_s11 = int_to_ptr.vmem [resolvable:$true] %s45_s11 }
   0xb   :  { %48 = dma.hbm_to_vmem [thread:$0]  %s44_s7, 32, %s46_s11, [#allocation7]  }
   0xc   :  { %s55_s12 = sshll.u32 %s603_s0, 4  ;;  %s604_s13 = smov 64   ;;  %s56_s12 = int_to_ptr.vmem [resolvable:$true] %s55_s12 }
   0xd   :  { %s605_s14 = smov 4  }
   0xe   :  { %61 = dma.hbm_to_vmem [thread:$0]  %s54_s9, 2048, %s56_s12, [#allocation10], %s604_s13, %s604_s13, %s605_s14  }
   0xf   :  { %590 = dma.done.wait [#allocation4], 128  }
  0x10   :  { %591 = vsyncadd [#allocation4], 4294967168 }
  0x11   :  { %592 = dma.done.wait [#allocation7], 672  }
  0x12   :  { %593 = vsyncadd [#allocation7], 4294966624 }
  0x13   :  { %594 = dma.done.wait [#allocation10], 2048  }
  0x14   :  { %595 = vsyncadd [#allocation10], 4294965248  ;;  %v95_v0 = vld [vmem:[#allocation6 + $0x20] sm:$0xff]  ;;  %vm125_vm0 = vcmask 1043456   ;;  %v368_v3 = vld [vmem:[#allocation6 + $0x10] sm:$0xf] }
  0x15   :  { %v109_v1 = vunpack.c.l.b16 %v95_v0  ;;  %v110_v2 = vunpack.c.h.b16 %v95_v0  ;;  %v443_v4 = vld [vmem:[#allocation6 + $0x14] sm:$0xf0]  ;;  %v442_v5 = vld [vmem:[#allocation6 + $0x14] sm:$0xf]  ;;  %v370_v8 = vld [vmem:[#allocation6 + $0x18] sm:$0xf0] }
  0x16   :  { %v451_v9 = vld [vmem:[#allocation9 + $0x38] sm:$0xff]  ;;  %v450_v13 = vld [vmem:[#allocation9 + $0x30] sm:$0xff]  ;;  %v369_v15 = vor.u32 %v443_v4, %v368_v3  ;;  %v373_v16 = vor.u32 %v442_v5, %v370_v8  ;;  %v362_v20 = vld [vmem:[#allocation6 + $0x8] sm:$0xf0]  ;;  %vm121_vm1 = vcmask 326656   ;;  %s606_s15 = smov [#allocation11]  }
  0x17   :  { %v115_v6 = vpack.c.b16 %v109_v1, %v109_v1  ;;  %v116_v7 = vpack.c.b16 %v110_v2, %v110_v2  ;;  %v459_v10 = vld [vmem:[#allocation9 + $0x78] sm:$0xff]  ;;  %311 = vmatpush.bf16.msra.mxu2 %v451_v9  ;;  %v458_v14 = vld [vmem:[#allocation9 + $0x70] sm:$0xff]  ;;  %v449_v21 = vld [vmem:[#allocation9 + $0x28] sm:$0xff]  ;;  %s344_s16 = sshll.u32 %s606_s15, 4  ;;  %s346_s19 = sshll.u32 %s660_s5, 4  ;;  %s345_s16 = int_to_ptr.vmem [resolvable:$true] %s344_s16  ;;  %s347_s19 = int_to_ptr.hbm [resolvable:$true] %s346_s19 }
  0x18   :  { %324 = vmatpush.bf16.msra.mxu3 %v459_v10  ;;  %v360_v17 = vld [vmem:[#allocation6] sm:$0xf]  ;;  %v441_v18 = vld [vmem:[#allocation6 + $0x4] sm:$0xf0]  ;;  %v440_v19 = vld [vmem:[#allocation6 + $0x4] sm:$0xf] }
  0x19   :  { %v127_v11 = vsel %vm125_vm0, %v115_v6, 0  ;;  %v130_v12 = vsel %vm125_vm0, %v116_v7, 0  ;;  %v457_v22 = vld [vmem:[#allocation9 + $0x68] sm:$0xff]  ;;  %v361_v23 = vor.u32 %v441_v18, %v360_v17  ;;  %v365_v24 = vor.u32 %v440_v19, %v362_v20  ;;  %v448_v27 = vld [vmem:[#allocation9 + $0x20] sm:$0xff]  ;;  %v447_v29 = vld [vmem:[#allocation9 + $0x18] sm:$0xff] }
  0x1a   :  { %137 = vmatpush.bf16.msra.mxu0 %v127_v11  ;;  %150 = vmatpush.bf16.msra.mxu1 %v130_v12  ;;  %v87_v25 = vld [vmem:[#allocation3] sm:$0xff]  ;;  %v456_v28 = vld [vmem:[#allocation9 + $0x60] sm:$0xff]  ;;  %v455_v30 = vld [vmem:[#allocation9 + $0x58] sm:$0xff] }
  0x1b   :  { %312 = vmatpush.bf16.msra.mxu2 %v450_v13  ;;  %v88_v26 = vpack.c.bf16 %v87_v25, %v87_v25  ;;  %v446_v31 = vld [vmem:[#allocation9 + $0x10] sm:$0xff]  ;;  %v445_v33 = vld [vmem:[#allocation9 + $0x8] sm:$0xff]  ;;  %v444_v35 = vld [vmem:[#allocation9] sm:$0xff] }
  0x1c   :  { %325 = vmatpush.bf16.msra.mxu3 %v458_v14  ;;  %v454_v32 = vld [vmem:[#allocation9 + $0x50] sm:$0xff]  ;;  %v453_v34 = vld [vmem:[#allocation9 + $0x48] sm:$0xff]  ;;  %v452_v36 = vld [vmem:[#allocation9 + $0x40] sm:$0xff] }
  0x1d   :  { %v167_v37 = vld [vmem:[#allocation8] sm:$0x3]  ;;  %v469_v50 = vld [vmem:[%s659_s4] ss:$0 sm:$0xff] }
  0x1e   :  { %138 = vmatpush.bf16.msra.mxu0 %v369_v15  ;;  %151 = vmatpush.bf16.msra.mxu1 %v373_v16  ;;  %v169_v38 = vperm.slane %v167_v37, 0  ;;  %v170_v39 = vperm.slane %v167_v37, 1 }
  0x1f   :  { %313 = vmatpush.bf16.msra.mxu2 %v449_v21 }
  0x20   :  { %326 = vmatpush.bf16.msra.mxu3 %v457_v22 }
  0x22   :  { %139 = vmatpush.bf16.msra.mxu0 %v361_v23  ;;  %152 = vmatpush.bf16.msra.mxu1 %v365_v24 }
  0x23   :  { %314 = vmatpush.bf16.msra.mxu2 %v448_v27 }
  0x24   :  { %327 = vmatpush.bf16.msra.mxu3 %v456_v28 }
  0x25   :  { %374 = vmatmul.msk.bf16.vlgmr.msra.gmra.mxu0 %vm121_vm1, %v88_v26  ;;  %375 = vmatmul.msk.bf16.vlgmr.msra.gmra.mxu1 %vm121_vm1, %v88_v26 }
  0x27   :  { %315 = vmatpush.bf16.msra.mxu2 %v447_v29 }
  0x28   :  { %328 = vmatpush.bf16.msra.mxu3 %v455_v30 }
  0x2b   :  { %316 = vmatpush.bf16.msra.mxu2 %v446_v31 }
  0x2c   :  { %329 = vmatpush.bf16.msra.mxu3 %v454_v32 }
  0x2f   :  { %317 = vmatpush.bf16.msra.mxu2 %v445_v33 }
  0x30   :  { %330 = vmatpush.bf16.msra.mxu3 %v453_v34 }
  0x33   :  { %318 = vmatpush.bf16.msra.mxu2 %v444_v35 }
  0x34   :  { %331 = vmatpush.bf16.msra.mxu3 %v452_v36 }
  0xa2   :  { %v141_v40 = vpop.f32.mrf.mxu0  ;;  %v154_v41 = vpop.f32.mrf.mxu1 }
  0xa3   :  { %v173_v42 = vadd.f32 %v169_v38, %v141_v40  ;;  %v174_v43 = vadd.f32 %v170_v39, %v154_v41 }
  0xa5   :  { %v175_v44 = vmax.f32 %v173_v42, 0.0  ;;  %v176_v45 = vmax.f32 %v174_v43, 0.0 }
  0xa7   :  { %v177_v46 = vpack.c.bf16 %v175_v44, %v175_v44  ;;  %v178_v47 = vpack.c.bf16 %v176_v45, %v176_v45 }
  0xa9   :  { %319 = vmatmul.bf16.vlgmr.msra.gmra.mxu2 %v177_v46  ;;  %332 = vmatmul.bf16.vlgmr.msra.gmra.mxu3 %v178_v47 }
  0xaa   :  { %v143_v48 = vpop.f32.mrf.mxu0  ;;  %v156_v49 = vpop.f32.mrf.mxu1 }
 0x12c   :  { %v320_v51 = vpop.f32.mrf.mxu2  ;;  %v333_v52 = vpop.f32.mrf.mxu3 }
 0x12d   :  { %v321_v53 = vadd.f32 %v469_v50, %v320_v51 }
 0x12f   :  { %v334_v54 = vadd.f32 %v333_v52, %v321_v53 }
 0x131   :  { %v337_v55 = vmax.f32 %v334_v54, 0.0 }
 0x133   :  { %338 = vst [vmem:[#allocation11] sm:$0xff] %v337_v55 }
 0x134   :  { %v322_v56 = vpop.f32.mrf.mxu2  ;;  %v335_v57 = vpop.f32.mrf.mxu3  ;;  %349 = dma.vmem_to_hbm [thread:$0]  %s345_s16, 128, %s347_s19, [#allocation5]  }
 0x135   :  { %596 = dma.done.wait [#allocation5], 128  }
 0x136   :  { %597 = vsyncadd [#allocation5], 4294967168 }
 0x137   :  { %354 = vsyncpa [#allocation4], 1 }
 0x138   :  { %355 = vsyncpa [#allocation7], 1 }
 0x139   :  { %356 = vsyncpa [#allocation10], 1 }
 0x13a   :  { %357 = vsyncpa [#allocation5], 1 }

</bundles_post_ra>
